<compile_context>
chip_gen: v7x
topology: tpu7x:2x2x1
jax: 0.10.0
libtpu: 0.0.40
codegen_flags: <defaults>
</compile_context>

<pallas_src>
import functools

import jax
import jax.numpy as jnp
import numpy as np
from jax import lax
from jax.experimental import pallas as pl
from jax.experimental.pallas import tpu as pltpu

BN_EPS = 1e-5
NUM_CLASSES = 10          # small synthetic value (module default is 1000)
LANE = 128
SUBLANE = 8


def _round_up(x, m):
    return (x + m - 1) // m * m


# ----------------------------- Pallas kernel --------------------------------
def _fused_probes_kernel(y_ref, w_ref, sel_ref, selwch_ref, b_ref, o_ref, *,
                         icnt, scp):
    """Both probes in one grid step: BatchNorm2d (batch stats) folded into a
    single full-spatial Conv2d matmul per probe.

    y_ref:      (P, NP, SCP)     zero-padded pooled activations, (c,h,w) flatten
    w_ref:      (P, SCP, KP)     zero-padded predictor weight, transposed
    sel_ref:    (P, SCP, CP)     0/1 selector: flat position -> channel
    selwch_ref: (P, CP, SCP+KP)  [sel.T | sel.T @ w] concatenated RHS
    b_ref:      (P, 1, KP)       zero-padded predictor bias
    o_ref:      (P, NP, KP)      logits (padding rows/cols sliced off outside)

    icnt: tuple of Python floats, 1/(N_true*Hp*Wp) per probe (baked constant).
    Invariant: padded channels produce scale_c = rsqrt(eps) ~ 316; they stay
    inert only because the matching rows of selwch (sel.T and wch) are zero.
    """
    n_probes = y_ref.shape[0]
    for j in range(n_probes):                       # static unroll (P == 2)
        y = y_ref[j]                                # (NP, SCP)

        # --- BatchNorm2d batch stats: one MXU push for sum & sum-of-squares
        stacked = jnp.concatenate([y, y * y], axis=0)            # (2*NP, SCP)
        sums = jnp.dot(stacked, sel_ref[j],
                       preferred_element_type=jnp.float32)       # (2*NP, CP)
        nrows = y.shape[0]
        mean_c = jnp.sum(sums[:nrows], axis=0, keepdims=True) * icnt[j]
        ey2_c = jnp.sum(sums[nrows:], axis=0, keepdims=True) * icnt[j]
        var_c = jnp.maximum(ey2_c - mean_c * mean_c, 0.0)        # biased var
        scale_c = lax.rsqrt(var_c + BN_EPS)                      # (1, CP)

        # --- BN fold: one MXU push yields both the per-position scale row and
        #     the mean-bias-correction row (concatenated [selt | wch] RHS).
        lhs2 = jnp.concatenate([scale_c, mean_c * scale_c], axis=0)  # (2, CP)
        fold = jnp.dot(lhs2, selwch_ref[j],
                       preferred_element_type=jnp.float32)       # (2, SCP+KP)
        scale_sc = fold[0:1, :scp]                               # (1, SCP)
        bias_corr = fold[1:2, scp:]                              # (1, KP)

        # --- out = (y*scale) @ W + b - (mean*scale) @ Wch  (implicit bcast)
        logits = jnp.dot(y * scale_sc, w_ref[j],
                         preferred_element_type=jnp.float32)     # (NP, KP)
        o_ref[j] = logits - bias_corr + b_ref[j]


def fused_probes_apply(y, w, sel, selwch, b, *, icnt, scp):
    """Single collapsed-grid pallas_call covering all probes."""
    P, NP_, SCP_ = y.shape
    KP_ = w.shape[-1]
    CP_ = sel.shape[-1]

    flops = P * (2 * (2 * NP_) * SCP_ * CP_        # stats matmul
                 + 2 * 2 * CP_ * (SCP_ + KP_)      # BN-fold matmul
                 + 2 * NP_ * SCP_ * KP_)           # logits matmul
    bytes_accessed = 4 * (y.size + w.size + sel.size + selwch.size + b.size
                          + P * NP_ * KP_)

    kernel = functools.partial(_fused_probes_kernel, icnt=icnt, scp=scp)
    return pl.pallas_call(
        kernel,
        out_shape=jax.ShapeDtypeStruct((P, NP_, KP_), jnp.float32),
        grid=(1,),
        in_specs=[
            pl.BlockSpec((P, NP_, SCP_), lambda i: (0, 0, 0)),
            pl.BlockSpec((P, SCP_, KP_), lambda i: (0, 0, 0)),
            pl.BlockSpec((P, SCP_, CP_), lambda i: (0, 0, 0)),
            pl.BlockSpec((P, CP_, SCP_ + KP_), lambda i: (0, 0, 0)),
            pl.BlockSpec((P, 1, KP_), lambda i: (0, 0, 0)),
        ],
        out_specs=pl.BlockSpec((P, NP_, KP_), lambda i: (0, 0, 0)),
        compiler_params=pltpu.CompilerParams(
            dimension_semantics=("arbitrary",)),
        cost_estimate=pl.CostEstimate(
            flops=int(flops),
            transcendentals=int(P * CP_),
            bytes_accessed=int(bytes_accessed)),
    )(y, w, sel, selwch, b)


# ----------------------------- plain-JAX glue --------------------------------
def maxpool2d(x, kernel, stride, pad):
    """PyTorch-style MaxPool2d on NCHW (pads with -inf)."""
    return lax.reduce_window(
        x, -jnp.inf, lax.max,
        window_dimensions=(1, 1, kernel, kernel),
        window_strides=(1, 1, stride, stride),
        padding=((0, 0), (0, 0), (pad, pad), (pad, pad)),
    )


def conv2d_nchw(x, w, b, padding=1):
    out = lax.conv_general_dilated(
        x, w, window_strides=(1, 1),
        padding=((padding, padding), (padding, padding)),
        dimension_numbers=('NCHW', 'OIHW', 'NCHW'))
    return out + b.reshape(1, -1, 1, 1)


def xavier_uniform(key, shape):
    # Conv2d weight (K, C, kh, kw): fan_in = C*kh*kw, fan_out = K*kh*kw, gain=1.
    k, c, kh, kw = shape
    fan_in, fan_out = c * kh * kw, k * kh * kw
    bound = float(np.sqrt(6.0 / (fan_in + fan_out)))
    return jax.random.uniform(key, shape, jnp.float32, minval=-bound, maxval=bound)


# ----------------------------- synthetic trunk + Probes ----------------------
# Trunk children (index: layer), mirroring the PyTorch trunk.children() walk:
#   0: Conv2d(3, 8, 3, padding=1)
#   1: ReLU                         <- probe 0  (downsampler cnvs[0] = MaxPool2d(6, 6, 3))
#   2: MaxPool2d(2, stride=2)
#   3: Conv2d(8, 16, 3, padding=1)
#   4: ReLU                         <- probe 1  (downsampler cnvs[1] = MaxPool2d(4, 4, 0))
PROBED_LAYERS = [1, 4]
CNVS = [(6, 6, 3), (4, 4, 0), (3, 3, 1), (3, 3, 1), (2, 2, 0)]  # (kernel, stride, pad)


def build_trunk_params(key):
    k0, k1 = jax.random.split(key, 2)
    return {
        "conv0_w": 0.1 * jax.random.normal(k0, (8, 3, 3, 3), jnp.float32),
        "conv0_b": jnp.zeros((8,), jnp.float32),
        "conv1_w": 0.1 * jax.random.normal(k1, (16, 8, 3, 3), jnp.float32),
        "conv1_b": jnp.zeros((16,), jnp.float32),
    }


def trunk_layers(params):
    return [
        ("conv0", lambda x: conv2d_nchw(x, params["conv0_w"], params["conv0_b"])),
        ("relu0", lambda x: jnp.maximum(x, 0.0)),
        ("pool0", lambda x: maxpool2d(x, 2, 2, 0)),
        ("conv1", lambda x: conv2d_nchw(x, params["conv1_w"], params["conv1_b"])),
        ("relu1", lambda x: jnp.maximum(x, 0.0)),
    ]


def build_probes(key, trunk_params, crop_size=16):
    """Mirrors Probes.__init__: walk trunk with a dummy input, attach probes."""
    layers = trunk_layers(trunk_params)
    x = jnp.zeros((2, 3, crop_size, crop_size), jnp.float32)
    probes = []
    j = 0
    for index, (_, fn) in enumerate(layers):
        x = fn(x)
        if index > max(PROBED_LAYERS):
            break
        if index in PROBED_LAYERS:
            pool_k, pool_s, pool_p = CNVS[j]
            j += 1
            y = maxpool2d(x, pool_k, pool_s, pool_p)
            _, c, hp, wp = y.shape
            key, wkey = jax.random.split(key)
            probes.append({
                "pool": (pool_k, pool_s, pool_p),
                "w": xavier_uniform(wkey, (NUM_CLASSES, c, hp, wp)),
                "b": jnp.zeros((NUM_CLASSES,), jnp.float32),
            })
    return probes


def build_probe_pack(probes, num_classes, n_batch):
    """Precompute the fused, padded, kernel-layout probe parameters.

    Hoisted out of the forward path: weight (K,C,Hp,Wp) -> flattened+transposed
    (SC, K), lane-padding, channel selector, and the concatenated
    [sel.T | sel.T@W] RHS used for the BN scale/mean fold.  Rows of that RHS
    for padded channels are left zero on purpose (neutralizes rsqrt(eps) scale
    of padded channels inside the kernel).
    """
    P = len(probes)
    meta = []
    for p in probes:
        _, c, hp, wp = p["w"].shape
        meta.append((p["pool"], c, hp, wp))
    SCP_ = _round_up(max(c * hp * wp for _, c, hp, wp in meta), LANE)
    CP_ = _round_up(max(c for _, c, _, _ in meta), LANE)
    KP_ = _round_up(num_classes, LANE)
    NP_ = _round_up(n_batch, SUBLANE)

    w_p = np.zeros((P, SCP_, KP_), np.float32)
    b_p = np.zeros((P, 1, KP_), np.float32)
    sel_p = np.zeros((P, SCP_, CP_), np.float32)
    selwch_p = np.zeros((P, CP_, SCP_ + KP_), np.float32)
    icnt = []
    for j, p in enumerate(probes):
        k, c, hp, wp = p["w"].shape
        s = hp * wp
        sc = c * s
        w2d = np.asarray(p["w"], np.float32).reshape(k, sc).T     # (SC, K), (c,h,w) order
        sel = np.repeat(np.eye(c, dtype=np.float32), s, axis=0)   # flat idx c*S+s -> channel c
        w_p[j, :sc, :k] = w2d
        b_p[j, 0, :k] = np.asarray(p["b"], np.float32)
        sel_p[j, :sc, :c] = sel
        selwch_p[j, :c, :sc] = sel.T                              # selector transpose
        selwch_p[j, :c, SCP_:SCP_ + k] = sel.T @ w2d              # per-channel weight sum
        icnt.append(1.0 / float(n_batch * s))
    pack = {"w": jnp.asarray(w_p), "b": jnp.asarray(b_p),
            "sel": jnp.asarray(sel_p), "selwch": jnp.asarray(selwch_p)}
    dims = {"SCP": SCP_, "CP": CP_, "KP": KP_, "NP": NP_,
            "meta": meta, "num_classes": num_classes, "n_batch": n_batch,
            "icnt": tuple(icnt)}
    return pack, dims


def make_probes_forward(trunk_params, pack, dims):
    """Jitted forward mirroring Probes.forward: trunk + fused Pallas probes."""
    layers = trunk_layers(trunk_params)
    deepest = max(PROBED_LAYERS)
    meta = dims["meta"]
    NP_, SCP_ = dims["NP"], dims["SCP"]
    n, k = dims["n_batch"], dims["num_classes"]
    icnt = dims["icnt"]
    P = len(meta)

    @jax.jit
    def fwd(x):
        assert x.shape[0] == n
        # Single preallocated (P, NP, SCP) slab — no per-probe pad+stack copies.
        y_stk = jnp.zeros((P, NP_, SCP_), jnp.float32)
        h = x
        for index, (_, fn) in enumerate(layers):
            h = fn(h)
            if index in PROBED_LAYERS:
                j = PROBED_LAYERS.index(index)
                (pk, ps, pp), c, hp, wp = meta[j]
                y = maxpool2d(h, pk, ps, pp)                  # (N, C, Hp, Wp)
                yf = y.reshape(n, c * hp * wp)                # PyTorch (c,h,w) flatten
                y_stk = y_stk.at[j, :n, :c * hp * wp].set(yf)
            if index == deepest:
                break
        out = fused_probes_apply(y_stk, pack["w"], pack["sel"],
                                 pack["selwch"], pack["b"],
                                 icnt=icnt, scp=SCP_)
        return [out[j, :n, :k] for j in range(P)]

    return fwd


def probes_forward_ref(x, trunk_params, probes):
    """Pure-JAX reference of the probe math (for correctness checking)."""
    outputs = []
    layers = trunk_layers(trunk_params)
    deepest = max(PROBED_LAYERS)
    for index, (_, fn) in enumerate(layers):
        x = fn(x)
        if index in PROBED_LAYERS:
            p = probes[PROBED_LAYERS.index(index)]
            y = maxpool2d(x, *p["pool"])
            mean = jnp.mean(y, axis=(0, 2, 3), keepdims=True)
            var = jnp.mean((y - mean) ** 2, axis=(0, 2, 3), keepdims=True)
            yn = (y - mean) / jnp.sqrt(var + BN_EPS)
            n = y.shape[0]
            k = p["w"].shape[0]
            out = yn.reshape(n, -1) @ p["w"].reshape(k, -1).T + p["b"]
            outputs.append(out)
        if index == deepest:
            break
    return outputs


if __name__ == "__main__":
    key = jax.random.PRNGKey(0)
    k_trunk, k_probe, k_x = jax.random.split(key, 3)

    trunk_params = build_trunk_params(k_trunk)
    probes = build_probes(k_probe, trunk_params, crop_size=16)

    x = jax.random.normal(k_x, (2, 3, 16, 16), jnp.float32)

    pack, dims = build_probe_pack(probes, NUM_CLASSES, n_batch=x.shape[0])
    fwd = make_probes_forward(trunk_params, pack, dims)

    outs = jax.block_until_ready(fwd(x))

    refs = probes_forward_ref(x, trunk_params, probes)
    for o, r in zip(outs, refs):
        assert o.shape == (2, NUM_CLASSES), o.shape
        np.testing.assert_allclose(np.asarray(o), np.asarray(r), rtol=1e-3, atol=1e-3)

    print("KERNEL_OK")
</pallas_src>

<mosaic_0001>
module attributes {stable_mosaic.version = 11 : i64} {
  func.func @_fused_probes_kernel(%arg0: i32, %arg1: memref<2x8x128xf32, #tpu.memory_space<vmem>>, %arg2: memref<2x128x128xf32, #tpu.memory_space<vmem>>, %arg3: memref<2x128x128xf32, #tpu.memory_space<vmem>>, %arg4: memref<2x128x256xf32, #tpu.memory_space<vmem>>, %arg5: memref<2x1x128xf32, #tpu.memory_space<vmem>>, %arg6: memref<2x8x128xf32, #tpu.memory_space<vmem>>) attributes {dimension_semantics = [#tpu.dimension_semantics<arbitrary>], iteration_bounds = array<i64: 1>, scalar_prefetch = 0 : i64, scratch_operands = 0 : i64, tpu.core_type = #tpu.core_type<tc>, window_params = [{pipeline_mode = #tpu.pipeline_mode<synchronous>, transform_indices = @transform_0, window_bounds = array<i64: 2, 8, 128>}, {pipeline_mode = #tpu.pipeline_mode<synchronous>, transform_indices = @transform_1, window_bounds = array<i64: 2, 128, 128>}, {pipeline_mode = #tpu.pipeline_mode<synchronous>, transform_indices = @transform_2, window_bounds = array<i64: 2, 128, 128>}, {pipeline_mode = #tpu.pipeline_mode<synchronous>, transform_indices = @transform_3, window_bounds = array<i64: 2, 128, 256>}, {pipeline_mode = #tpu.pipeline_mode<synchronous>, transform_indices = @transform_4, window_bounds = array<i64: 2, 1, 128>}, {pipeline_mode = #tpu.pipeline_mode<synchronous>, transform_indices = @transform_5, window_bounds = array<i64: 2, 8, 128>}]} {
    %c0 = arith.constant 0 : index
    %c0_0 = arith.constant 0 : index
    %c0_1 = arith.constant 0 : index
    %0 = vector.load %arg1[%c0, %c0_0, %c0_1] : memref<2x8x128xf32, #tpu.memory_space<vmem>>, vector<1x8x128xf32>
    %1 = vector.shape_cast %0 : vector<1x8x128xf32> to vector<8x128xf32>
    %2 = arith.mulf %1, %1 : vector<8x128xf32>
    %3 = tpu.concatenate %1, %2 in 0 : vector<8x128xf32>, vector<8x128xf32> -> vector<16x128xf32>
    %c0_2 = arith.constant 0 : index
    %c0_3 = arith.constant 0 : index
    %c0_4 = arith.constant 0 : index
    %4 = vector.load %arg3[%c0_2, %c0_3, %c0_4] : memref<2x128x128xf32, #tpu.memory_space<vmem>>, vector<1x128x128xf32>
    %5 = vector.shape_cast %4 : vector<1x128x128xf32> to vector<128x128xf32>
    %cst = arith.constant dense<0.000000e+00> : vector<16x128xf32>
    %6 = tpu.matmul %3, %5, %cst {dimension_numbers = #tpu.dot_dimension_numbers<[1], [0], [0], [1], [0, 0, 1, 1], [], []>} : vector<16x128xf32>, vector<128x128xf32>, vector<16x128xf32> -> vector<16x128xf32>
    %7 = vector.extract_strided_slice %6 {offsets = [0, 0], sizes = [8, 128], strides = [1, 1]} : vector<16x128xf32> to vector<8x128xf32>
    %cst_5 = arith.constant dense<0.000000e+00> : vector<128xf32>
    %8 = vector.multi_reduction <add>, %7, %cst_5 [0] : vector<8x128xf32> to vector<128xf32>
    %9 = vector.shape_cast %8 : vector<128xf32> to vector<1x128xf32>
    %cst_6 = arith.constant 0.055555556 : f32
    %10 = vector.broadcast %cst_6 : f32 to vector<1x128xf32>
    %11 = arith.mulf %9, %10 : vector<1x128xf32>
    %12 = vector.extract_strided_slice %6 {offsets = [8, 0], sizes = [8, 128], strides = [1, 1]} : vector<16x128xf32> to vector<8x128xf32>
    %cst_7 = arith.constant dense<0.000000e+00> : vector<128xf32>
    %13 = vector.multi_reduction <add>, %12, %cst_7 [0] : vector<8x128xf32> to vector<128xf32>
    %14 = vector.shape_cast %13 : vector<128xf32> to vector<1x128xf32>
    %cst_8 = arith.constant 0.055555556 : f32
    %15 = vector.broadcast %cst_8 : f32 to vector<1x128xf32>
    %16 = arith.mulf %14, %15 : vector<1x128xf32>
    %17 = arith.mulf %11, %11 : vector<1x128xf32>
    %18 = arith.subf %16, %17 : vector<1x128xf32>
    %cst_9 = arith.constant 0.000000e+00 : f32
    %19 = vector.broadcast %cst_9 : f32 to vector<1x128xf32>
    %20 = arith.maximumf %18, %19 : vector<1x128xf32>
    %cst_10 = arith.constant 9.99999974E-6 : f32
    %21 = vector.broadcast %cst_10 : f32 to vector<1x128xf32>
    %22 = arith.addf %20, %21 : vector<1x128xf32>
    %23 = math.rsqrt %22 : vector<1x128xf32>
    %24 = arith.mulf %11, %23 : vector<1x128xf32>
    %25 = tpu.concatenate %23, %24 in 0 : vector<1x128xf32>, vector<1x128xf32> -> vector<2x128xf32>
    %c0_11 = arith.constant 0 : index
    %c0_12 = arith.constant 0 : index
    %c0_13 = arith.constant 0 : index
    %26 = vector.load %arg4[%c0_11, %c0_12, %c0_13] : memref<2x128x256xf32, #tpu.memory_space<vmem>>, vector<1x128x256xf32>
    %27 = vector.shape_cast %26 : vector<1x128x256xf32> to vector<128x256xf32>
    %cst_14 = arith.constant dense<0.000000e+00> : vector<2x256xf32>
    %28 = tpu.matmul %25, %27, %cst_14 {dimension_numbers = #tpu.dot_dimension_numbers<[1], [0], [0], [1], [0, 0, 1, 1], [], []>} : vector<2x128xf32>, vector<128x256xf32>, vector<2x256xf32> -> vector<2x256xf32>
    %29 = vector.extract_strided_slice %28 {offsets = [0, 0], sizes = [1, 128], strides = [1, 1]} : vector<2x256xf32> to vector<1x128xf32>
    %30 = vector.extract_strided_slice %28 {offsets = [1, 128], sizes = [1, 128], strides = [1, 1]} : vector<2x256xf32> to vector<1x128xf32>
    %31 = vector.broadcast %29 : vector<1x128xf32> to vector<8x128xf32>
    %32 = arith.mulf %1, %31 : vector<8x128xf32>
    %c0_15 = arith.constant 0 : index
    %c0_16 = arith.constant 0 : index
    %c0_17 = arith.constant 0 : index
    %33 = vector.load %arg2[%c0_15, %c0_16, %c0_17] : memref<2x128x128xf32, #tpu.memory_space<vmem>>, vector<1x128x128xf32>
    %34 = vector.shape_cast %33 : vector<1x128x128xf32> to vector<128x128xf32>
    %cst_18 = arith.constant dense<0.000000e+00> : vector<8x128xf32>
    %35 = tpu.matmul %32, %34, %cst_18 {dimension_numbers = #tpu.dot_dimension_numbers<[1], [0], [0], [1], [0, 0, 1, 1], [], []>} : vector<8x128xf32>, vector<128x128xf32>, vector<8x128xf32> -> vector<8x128xf32>
    %36 = vector.broadcast %30 : vector<1x128xf32> to vector<8x128xf32>
    %37 = arith.subf %35, %36 : vector<8x128xf32>
    %c0_19 = arith.constant 0 : index
    %c0_20 = arith.constant 0 : index
    %c0_21 = arith.constant 0 : index
    %38 = vector.load %arg5[%c0_19, %c0_20, %c0_21] : memref<2x1x128xf32, #tpu.memory_space<vmem>>, vector<1x1x128xf32>
    %39 = vector.shape_cast %38 : vector<1x1x128xf32> to vector<1x128xf32>
    %40 = vector.broadcast %39 : vector<1x128xf32> to vector<8x128xf32>
    %41 = arith.addf %37, %40 : vector<8x128xf32>
    %c0_22 = arith.constant 0 : index
    %c0_23 = arith.constant 0 : index
    %c0_24 = arith.constant 0 : index
    %42 = vector.load %arg6[%c0_22, %c0_23, %c0_24] : memref<2x8x128xf32, #tpu.memory_space<vmem>>, vector<1x8x128xf32>
    %43 = vector.shape_cast %42 : vector<1x8x128xf32> to vector<8x128xf32>
    %44 = vector.shape_cast %41 : vector<8x128xf32> to vector<1x8x128xf32>
    tpu.vector_store %arg6[%c0_22, %c0_23, %c0_24], %44 {strides = array<i32>} : memref<2x8x128xf32, #tpu.memory_space<vmem>>, vector<1x8x128xf32>,
    %c1 = arith.constant 1 : index
    %c0_25 = arith.constant 0 : index
    %c0_26 = arith.constant 0 : index
    %45 = vector.load %arg1[%c1, %c0_25, %c0_26] : memref<2x8x128xf32, #tpu.memory_space<vmem>>, vector<1x8x128xf32>
    %46 = vector.shape_cast %45 : vector<1x8x128xf32> to vector<8x128xf32>
    %47 = arith.mulf %46, %46 : vector<8x128xf32>
    %48 = tpu.concatenate %46, %47 in 0 : vector<8x128xf32>, vector<8x128xf32> -> vector<16x128xf32>
    %c1_27 = arith.constant 1 : index
    %c0_28 = arith.constant 0 : index
    %c0_29 = arith.constant 0 : index
    %49 = vector.load %arg3[%c1_27, %c0_28, %c0_29] : memref<2x128x128xf32, #tpu.memory_space<vmem>>, vector<1x128x128xf32>
    %50 = vector.shape_cast %49 : vector<1x128x128xf32> to vector<128x128xf32>
    %cst_30 = arith.constant dense<0.000000e+00> : vector<16x128xf32>
    %51 = tpu.matmul %48, %50, %cst_30 {dimension_numbers = #tpu.dot_dimension_numbers<[1], [0], [0], [1], [0, 0, 1, 1], [], []>} : vector<16x128xf32>, vector<128x128xf32>, vector<16x128xf32> -> vector<16x128xf32>
    %52 = vector.extract_strided_slice %51 {offsets = [0, 0], sizes = [8, 128], strides = [1, 1]} : vector<16x128xf32> to vector<8x128xf32>
    %cst_31 = arith.constant dense<0.000000e+00> : vector<128xf32>
    %53 = vector.multi_reduction <add>, %52, %cst_31 [0] : vector<8x128xf32> to vector<128xf32>
    %54 = vector.shape_cast %53 : vector<128xf32> to vector<1x128xf32>
    %cst_32 = arith.constant 1.250000e-01 : f32
    %55 = vector.broadcast %cst_32 : f32 to vector<1x128xf32>
    %56 = arith.mulf %54, %55 : vector<1x128xf32>
    %57 = vector.extract_strided_slice %51 {offsets = [8, 0], sizes = [8, 128], strides = [1, 1]} : vector<16x128xf32> to vector<8x128xf32>
    %cst_33 = arith.constant dense<0.000000e+00> : vector<128xf32>
    %58 = vector.multi_reduction <add>, %57, %cst_33 [0] : vector<8x128xf32> to vector<128xf32>
    %59 = vector.shape_cast %58 : vector<128xf32> to vector<1x128xf32>
    %cst_34 = arith.constant 1.250000e-01 : f32
    %60 = vector.broadcast %cst_34 : f32 to vector<1x128xf32>
    %61 = arith.mulf %59, %60 : vector<1x128xf32>
    %62 = arith.mulf %56, %56 : vector<1x128xf32>
    %63 = arith.subf %61, %62 : vector<1x128xf32>
    %cst_35 = arith.constant 0.000000e+00 : f32
    %64 = vector.broadcast %cst_35 : f32 to vector<1x128xf32>
    %65 = arith.maximumf %63, %64 : vector<1x128xf32>
    %cst_36 = arith.constant 9.99999974E-6 : f32
    %66 = vector.broadcast %cst_36 : f32 to vector<1x128xf32>
    %67 = arith.addf %65, %66 : vector<1x128xf32>
    %68 = math.rsqrt %67 : vector<1x128xf32>
    %69 = arith.mulf %56, %68 : vector<1x128xf32>
    %70 = tpu.concatenate %68, %69 in 0 : vector<1x128xf32>, vector<1x128xf32> -> vector<2x128xf32>
    %c1_37 = arith.constant 1 : index
    %c0_38 = arith.constant 0 : index
    %c0_39 = arith.constant 0 : index
    %71 = vector.load %arg4[%c1_37, %c0_38, %c0_39] : memref<2x128x256xf32, #tpu.memory_space<vmem>>, vector<1x128x256xf32>
    %72 = vector.shape_cast %71 : vector<1x128x256xf32> to vector<128x256xf32>
    %cst_40 = arith.constant dense<0.000000e+00> : vector<2x256xf32>
    %73 = tpu.matmul %70, %72, %cst_40 {dimension_numbers = #tpu.dot_dimension_numbers<[1], [0], [0], [1], [0, 0, 1, 1], [], []>} : vector<2x128xf32>, vector<128x256xf32>, vector<2x256xf32> -> vector<2x256xf32>
    %74 = vector.extract_strided_slice %73 {offsets = [0, 0], sizes = [1, 128], strides = [1, 1]} : vector<2x256xf32> to vector<1x128xf32>
    %75 = vector.extract_strided_slice %73 {offsets = [1, 128], sizes = [1, 128], strides = [1, 1]} : vector<2x256xf32> to vector<1x128xf32>
    %76 = vector.broadcast %74 : vector<1x128xf32> to vector<8x128xf32>
    %77 = arith.mulf %46, %76 : vector<8x128xf32>
    %c1_41 = arith.constant 1 : index
    %c0_42 = arith.constant 0 : index
    %c0_43 = arith.constant 0 : index
    %78 = vector.load %arg2[%c1_41, %c0_42, %c0_43] : memref<2x128x128xf32, #tpu.memory_space<vmem>>, vector<1x128x128xf32>
    %79 = vector.shape_cast %78 : vector<1x128x128xf32> to vector<128x128xf32>
    %cst_44 = arith.constant dense<0.000000e+00> : vector<8x128xf32>
    %80 = tpu.matmul %77, %79, %cst_44 {dimension_numbers = #tpu.dot_dimension_numbers<[1], [0], [0], [1], [0, 0, 1, 1], [], []>} : vector<8x128xf32>, vector<128x128xf32>, vector<8x128xf32> -> vector<8x128xf32>
    %81 = vector.broadcast %75 : vector<1x128xf32> to vector<8x128xf32>
    %82 = arith.subf %80, %81 : vector<8x128xf32>
    %c1_45 = arith.constant 1 : index
    %c0_46 = arith.constant 0 : index
    %c0_47 = arith.constant 0 : index
    %83 = vector.load %arg5[%c1_45, %c0_46, %c0_47] : memref<2x1x128xf32, #tpu.memory_space<vmem>>, vector<1x1x128xf32>
    %84 = vector.shape_cast %83 : vector<1x1x128xf32> to vector<1x128xf32>
    %85 = vector.broadcast %84 : vector<1x128xf32> to vector<8x128xf32>
    %86 = arith.addf %82, %85 : vector<8x128xf32>
    %c1_48 = arith.constant 1 : index
    %c0_49 = arith.constant 0 : index
    %c0_50 = arith.constant 0 : index
    %87 = vector.load %arg6[%c1_48, %c0_49, %c0_50] : memref<2x8x128xf32, #tpu.memory_space<vmem>>, vector<1x8x128xf32>
    %88 = vector.shape_cast %87 : vector<1x8x128xf32> to vector<8x128xf32>
    %89 = vector.shape_cast %86 : vector<8x128xf32> to vector<1x8x128xf32>
    tpu.vector_store %arg6[%c1_48, %c0_49, %c0_50], %89 {strides = array<i32>} : memref<2x8x128xf32, #tpu.memory_space<vmem>>, vector<1x8x128xf32>,
    return
  }
  func.func @transform_0(%arg0: i32) -> (i32, i32, i32) {
    %c0_i32 = arith.constant 0 : i32
    %c0_i32_0 = arith.constant 0 : i32
    %c0_i32_1 = arith.constant 0 : i32
    %c0_i32_2 = arith.constant 0 : i32
    return %c0_i32, %c0_i32_0, %c0_i32_1 : i32, i32, i32
  }
  func.func @transform_1(%arg0: i32) -> (i32, i32, i32) {
    %c0_i32 = arith.constant 0 : i32
    %c0_i32_0 = arith.constant 0 : i32
    %c0_i32_1 = arith.constant 0 : i32
    %c0_i32_2 = arith.constant 0 : i32
    return %c0_i32, %c0_i32_0, %c0_i32_1 : i32, i32, i32
  }
  func.func @transform_2(%arg0: i32) -> (i32, i32, i32) {
    %c0_i32 = arith.constant 0 : i32
    %c0_i32_0 = arith.constant 0 : i32
    %c0_i32_1 = arith.constant 0 : i32
    %c0_i32_2 = arith.constant 0 : i32
    return %c0_i32, %c0_i32_0, %c0_i32_1 : i32, i32, i32
  }
  func.func @transform_3(%arg0: i32) -> (i32, i32, i32) {
    %c0_i32 = arith.constant 0 : i32
    %c0_i32_0 = arith.constant 0 : i32
    %c0_i32_1 = arith.constant 0 : i32
    %c0_i32_2 = arith.constant 0 : i32
    return %c0_i32, %c0_i32_0, %c0_i32_1 : i32, i32, i32
  }
  func.func @transform_4(%arg0: i32) -> (i32, i32, i32) {
    %c0_i32 = arith.constant 0 : i32
    %c0_i32_0 = arith.constant 0 : i32
    %c0_i32_1 = arith.constant 0 : i32
    %c0_i32_2 = arith.constant 0 : i32
    return %c0_i32, %c0_i32_0, %c0_i32_1 : i32, i32, i32
  }
  func.func @transform_5(%arg0: i32) -> (i32, i32, i32) {
    %c0_i32 = arith.constant 0 : i32
    %c0_i32_0 = arith.constant 0 : i32
    %c0_i32_1 = arith.constant 0 : i32
    %c0_i32_2 = arith.constant 0 : i32
    return %c0_i32, %c0_i32_0, %c0_i32_1 : i32, i32, i32
  }
}

</mosaic_0001>

<bundles_post_ra>
// kernel: fwd.1
= control target key start
LH: loop header
LB: loop body
LE: loop exit
PB: predicated region body
PF: predicated region fallthrough
CT: control target
= control target key end

     0   :  { %vm133_vm0 = vcmask 1040384   ;;  %vm1139_vm1 = vmmov 0   ;;  %s1621_s2 = inlined_call_operand.vmem [shape: f32[2,128,128], index: 2, kind: input, shape index: {}]   ;;  %s1622_s0 = inlined_call_operand.vmem [shape: f32[2,8,128], index: 0, kind: input, shape index: {}]   ;;  %s1623_s3 = inlined_call_operand.vmem [shape: f32[2,128,256], index: 3, kind: input, shape index: {}]   ;;  %s1624_s1 = inlined_call_operand.vmem [shape: f32[2,128,128], index: 1, kind: input, shape index: {}]   ;;  %s1625_s4 = inlined_call_operand.vmem [shape: f32[2,1,128], index: 4, kind: input, shape index: {}]   ;;  %s1626_s5 = inlined_call_operand.vmem [shape: f32[2,8,128], index: 5, kind: output, shape index: {}]  }
   0x1   :  { %v22_v0 = vld [vmem:[%s1621_s2] sm:$0xff]  ;;  %v23_v1 = vld [vmem:[%s1621_s2 + $0x8] sm:$0xff]  ;;  %v24_v2 = vld [vmem:[%s1621_s2 + $0x10] sm:$0xff] }
   0x2   :  { %v954_v3 = vpack.c.bf16 %v23_v1, %v22_v0  ;;  %v25_v4 = vld [vmem:[%s1621_s2 + $0x18] sm:$0xff]  ;;  %v26_v6 = vld [vmem:[%s1621_s2 + $0x20] sm:$0xff]  ;;  %v27_v7 = vld [vmem:[%s1621_s2 + $0x28] sm:$0xff] }
   0x3   :  { %v958_v5 = vpack.c.bf16 %v25_v4, %v24_v2  ;;  %v962_v8 = vpack.c.bf16 %v27_v7, %v26_v6  ;;  %v1191_v9 = vld [vmem:[%s1622_s0] sm:$0xff]  ;;  %v28_v10 = vld [vmem:[%s1621_s2 + $0x30] sm:$0xff]  ;;  %v29_v11 = vld [vmem:[%s1621_s2 + $0x38] sm:$0xff] }
   0x4   :  { %955 = vmatprep.subr.bf16.mxu0 %v954_v3  ;;  %846 = vmatprep.mubr.f32.mxu0 %v1191_v9  ;;  %v966_v12 = vpack.c.bf16 %v29_v11, %v28_v10  ;;  %v30_v13 = vld [vmem:[%s1621_s2 + $0x40] sm:$0xff]  ;;  %v31_v14 = vld [vmem:[%s1621_s2 + $0x48] sm:$0xff]  ;;  %v32_v16 = vld [vmem:[%s1621_s2 + $0x50] sm:$0xff]  ;;  %v21_v25 = vmul.f32 %v1191_v9, %v1191_v9 }
   0x5   :  { %957 = vmatpush3.bf16.msra.mxu0 %v954_v3  ;;  %v970_v15 = vpack.c.bf16 %v31_v14, %v30_v13  ;;  %v33_v17 = vld [vmem:[%s1621_s2 + $0x58] sm:$0xff]  ;;  %v34_v19 = vld [vmem:[%s1621_s2 + $0x60] sm:$0xff]  ;;  %v35_v20 = vld [vmem:[%s1621_s2 + $0x68] sm:$0xff] }
   0x6   :  { %959 = vmatprep.subr.bf16.mxu0 %v958_v5  ;;  %v974_v18 = vpack.c.bf16 %v33_v17, %v32_v16  ;;  %v978_v21 = vpack.c.bf16 %v35_v20, %v34_v19  ;;  %v36_v22 = vld [vmem:[%s1621_s2 + $0x70] sm:$0xff]  ;;  %v37_v23 = vld [vmem:[%s1621_s2 + $0x78] sm:$0xff]  ;;  %v136_v26 = vld [vmem:[%s1623_s3 + $0x8] sm:$0xff] }
   0x7   :  { %v982_v24 = vpack.c.bf16 %v37_v23, %v36_v22  ;;  %v138_v27 = vld [vmem:[%s1623_s3 + $0x18] sm:$0xff]  ;;  %v135_v29 = vld [vmem:[%s1623_s3] sm:$0xff]  ;;  %v137_v30 = vld [vmem:[%s1623_s3 + $0x10] sm:$0xff] }
   0x8   :  { %v986_v28 = vpack.c.bf16 %v138_v27, %v136_v26  ;;  %v988_v31 = vpack.c.bf16 %v137_v30, %v135_v29  ;;  %v140_v32 = vld [vmem:[%s1623_s3 + $0x28] sm:$0xff]  ;;  %v142_v33 = vld [vmem:[%s1623_s3 + $0x38] sm:$0xff]  ;;  %v139_v35 = vld [vmem:[%s1623_s3 + $0x20] sm:$0xff] }
   0x9   :  { %961 = vmatpush3.bf16.msra.mxu0 %v958_v5  ;;  %v990_v34 = vpack.c.bf16 %v142_v33, %v140_v32  ;;  %v141_v36 = vld [vmem:[%s1623_s3 + $0x30] sm:$0xff]  ;;  %v144_v38 = vld [vmem:[%s1623_s3 + $0x48] sm:$0xff]  ;;  %v146_v39 = vld [vmem:[%s1623_s3 + $0x58] sm:$0xff]  ;;  %v1137_v5 = vmov 0.0  }
   0xa   :  { %963 = vmatprep.subr.bf16.mxu0 %v962_v8  ;;  %987 = vmatprep.subr.bf16.mxu1 %v986_v28  ;;  %v992_v37 = vpack.c.bf16 %v141_v36, %v139_v35  ;;  %v994_v40 = vpack.c.bf16 %v146_v39, %v144_v38  ;;  %v143_v41 = vld [vmem:[%s1623_s3 + $0x40] sm:$0xff]  ;;  %v145_v42 = vld [vmem:[%s1623_s3 + $0x50] sm:$0xff]  ;;  %v148_v44 = vld [vmem:[%s1623_s3 + $0x68] sm:$0xff] }
   0xb   :  { %989 = vmatpush1.bf16.msra.mxu1 %v988_v31  ;;  %v996_v43 = vpack.c.bf16 %v145_v42, %v143_v41  ;;  %v150_v45 = vld [vmem:[%s1623_s3 + $0x78] sm:$0xff]  ;;  %v147_v47 = vld [vmem:[%s1623_s3 + $0x60] sm:$0xff]  ;;  %v149_v48 = vld [vmem:[%s1623_s3 + $0x70] sm:$0xff]  ;;  %231 = vmatprep.mubr.f32.mxu1 %v1137_v5 }
   0xc   :  { %991 = vmatprep.subr.bf16.mxu1 %v990_v34  ;;  %v998_v46 = vpack.c.bf16 %v150_v45, %v148_v44  ;;  %v1000_v49 = vpack.c.bf16 %v149_v48, %v147_v47  ;;  %v152_v50 = vld [vmem:[%s1623_s3 + $0x88] sm:$0xff]  ;;  %v154_v51 = vld [vmem:[%s1623_s3 + $0x98] sm:$0xff]  ;;  %v151_v53 = vld [vmem:[%s1623_s3 + $0x80] sm:$0xff] }
   0xd   :  { %965 = vmatpush3.bf16.msra.mxu0 %v962_v8  ;;  %v1002_v52 = vpack.c.bf16 %v154_v51, %v152_v50  ;;  %v153_v54 = vld [vmem:[%s1623_s3 + $0x90] sm:$0xff]  ;;  %v156_v56 = vld [vmem:[%s1623_s3 + $0xa8] sm:$0xff]  ;;  %v158_v57 = vld [vmem:[%s1623_s3 + $0xb8] sm:$0xff] }
   0xe   :  { %967 = vmatprep.subr.bf16.mxu0 %v966_v12  ;;  %v1004_v55 = vpack.c.bf16 %v153_v54, %v151_v53  ;;  %v1006_v58 = vpack.c.bf16 %v158_v57, %v156_v56  ;;  %v155_v59 = vld [vmem:[%s1623_s3 + $0xa0] sm:$0xff]  ;;  %v157_v60 = vld [vmem:[%s1623_s3 + $0xb0] sm:$0xff]  ;;  %v160_v62 = vld [vmem:[%s1623_s3 + $0xc8] sm:$0xff] }
   0xf   :  { %993 = vmatpush1.bf16.msra.mxu1 %v992_v37  ;;  %v1008_v61 = vpack.c.bf16 %v157_v60, %v155_v59  ;;  %v162_v63 = vld [vmem:[%s1623_s3 + $0xd8] sm:$0xff]  ;;  %v159_v0 = vld [vmem:[%s1623_s3 + $0xc0] sm:$0xff]  ;;  %v161_v2 = vld [vmem:[%s1623_s3 + $0xd0] sm:$0xff] }
  0x10   :  { %995 = vmatprep.subr.bf16.mxu1 %v994_v40  ;;  %v1010_v1 = vpack.c.bf16 %v162_v63, %v160_v62  ;;  %v164_v3 = vld [vmem:[%s1623_s3 + $0xe8] sm:$0xff]  ;;  %v166_v4 = vld [vmem:[%s1623_s3 + $0xf8] sm:$0xff]  ;;  %v1012_v6 = vpack.c.bf16 %v161_v2, %v159_v0  ;;  %v163_v8 = vld [vmem:[%s1623_s3 + $0xe0] sm:$0xff] }
  0x11   :  { %969 = vmatpush3.bf16.msra.mxu0 %v966_v12  ;;  %v1014_v7 = vpack.c.bf16 %v166_v4, %v164_v3  ;;  %v165_v10 = vld [vmem:[%s1623_s3 + $0xf0] sm:$0xff]  ;;  %v677_v11 = vld [vmem:[%s1621_s2 + $0x80] sm:$0xff]  ;;  %v678_v12 = vld [vmem:[%s1621_s2 + $0x88] sm:$0xff] }
  0x12   :  { %971 = vmatprep.subr.bf16.mxu0 %v970_v15  ;;  %v1016_v13 = vpack.c.bf16 %v165_v10, %v163_v8  ;;  %v1329_v14 = vpack.c.bf16 %v678_v12, %v677_v11  ;;  %v243_v16 = vld [vmem:[%s1624_s1] sm:$0xff]  ;;  %v244_v17 = vld [vmem:[%s1624_s1 + $0x8] sm:$0xff]  ;;  %v246_v20 = vld [vmem:[%s1624_s1 + $0x18] sm:$0xff] }
  0x13   :  { %997 = vmatpush1.bf16.msra.mxu1 %v996_v43  ;;  %v1019_v19 = vpack.c.bf16 %v244_v17, %v243_v16  ;;  %v247_v22 = vld [vmem:[%s1624_s1 + $0x20] sm:$0xff]  ;;  %v248_v23 = vld [vmem:[%s1624_s1 + $0x28] sm:$0xff]  ;;  %v250_v26 = vld [vmem:[%s1624_s1 + $0x38] sm:$0xff] }
  0x14   :  { %999 = vmatprep.subr.bf16.mxu1 %v998_v46  ;;  %v251_v28 = vld [vmem:[%s1624_s1 + $0x40] sm:$0xff]  ;;  %v252_v29 = vld [vmem:[%s1624_s1 + $0x48] sm:$0xff]  ;;  %v253_v31 = vld [vmem:[%s1624_s1 + $0x50] sm:$0xff] }
  0x15   :  { %973 = vmatpush3.bf16.msra.mxu0 %v970_v15  ;;  %v1138_v15 = vmov 0.0|0.0   ;;  %v1031_v30 = vpack.c.bf16 %v252_v29, %v251_v28  ;;  %v254_v32 = vld [vmem:[%s1624_s1 + $0x58] sm:$0xff]  ;;  %v255_v34 = vld [vmem:[%s1624_s1 + $0x60] sm:$0xff]  ;;  %v256_v35 = vld [vmem:[%s1624_s1 + $0x68] sm:$0xff]  ;;  %v238_v28 = vlaneseq }
  0x16   :  { %975 = vmatprep.subr.bf16.mxu0 %v974_v18  ;;  %v1034_v33 = vpack.c.bf16 %v254_v32, %v253_v31  ;;  %v1037_v36 = vpack.c.bf16 %v256_v35, %v255_v34  ;;  %v679_v57 = vld [vmem:[%s1621_s2 + $0x90] sm:$0xff]  ;;  %v1391_v62 = vld [vmem:[%s1622_s0 + $0x8] sm:$0xff]  ;;  %v681_v0 = vld [vmem:[%s1621_s2 + $0xa0] sm:$0xff] }
  0x17   :  { %1001 = vmatpush1.bf16.msra.mxu1 %v1000_v49  ;;  %v683_v3 = vld [vmem:[%s1621_s2 + $0xb0] sm:$0xff]  ;;  %v684_v4 = vld [vmem:[%s1621_s2 + $0xb8] sm:$0xff]  ;;  %v686_v8 = vld [vmem:[%s1621_s2 + $0xc8] sm:$0xff]  ;;  %v1449_v29 = vshrl.u32 %v238_v28, 7 }
  0x18   :  { %1003 = vmatprep.subr.bf16.mxu1 %v1002_v52  ;;  %v687_v11 = vld [vmem:[%s1621_s2 + $0xd0] sm:$0xff]  ;;  %v688_v12 = vld [vmem:[%s1621_s2 + $0xd8] sm:$0xff]  ;;  %v690_v16 = vld [vmem:[%s1621_s2 + $0xe8] sm:$0xff] }
  0x19   :  { %977 = vmatpush3.bf16.msra.mxu0 %v974_v18  ;;  %v245_v18 = vld [vmem:[%s1624_s1 + $0x10] sm:$0xff]  ;;  %v693_v31 = vld [vmem:[%s1623_s3 + $0x100] sm:$0xff]  ;;  %v698_v34 = vld [vmem:[%s1623_s3 + $0x128] sm:$0xff] }
  0x1a   :  { %979 = vmatprep.subr.bf16.mxu0 %v978_v21  ;;  %v695_v32 = vld [vmem:[%s1623_s3 + $0x110] sm:$0xff]  ;;  %v700_v35 = vld [vmem:[%s1623_s3 + $0x138] sm:$0xff] }
  0x1b   :  { %1005 = vmatpush1.bf16.msra.mxu1 %v1004_v55 }
  0x1c   :  { %1007 = vmatprep.subr.bf16.mxu1 %v1006_v58  ;;  %v680_v58 = vld [vmem:[%s1621_s2 + $0x98] sm:$0xff] }
  0x1d   :  { %981 = vmatpush3.bf16.msra.mxu0 %v978_v21  ;;  %v1022_v21 = vpack.c.bf16 %v246_v20, %v245_v18  ;;  %v691_v18 = vld [vmem:[%s1621_s2 + $0xf0] sm:$0xff] }
  0x1e   :  { %983 = vmatprep.subr.bf16.mxu0 %v982_v24 }
  0x1f   :  { %1009 = vmatpush1.bf16.msra.mxu1 %v1008_v61  ;;  %v1046_v61 = vpack.c.bf16 %v680_v58, %v679_v57  ;;  %v709_v57 = vld [vmem:[%s1623_s3 + $0x180] sm:$0xff]  ;;  %v711_v58 = vld [vmem:[%s1623_s3 + $0x190] sm:$0xff] }
  0x20   :  { %1011 = vmatprep.subr.bf16.mxu1 %v1010_v1  ;;  %v682_v1 = vld [vmem:[%s1621_s2 + $0xa8] sm:$0xff] }
  0x21   :  { %985 = vmatpush3.bf16.msra.mxu0 %v982_v24  ;;  %v1025_v24 = vpack.c.bf16 %v248_v23, %v247_v22  ;;  %v1050_v2 = vpack.c.bf16 %v682_v1, %v681_v0  ;;  %v257_v22 = vld [vmem:[%s1624_s1 + $0x70] sm:$0xff]  ;;  %v258_v23 = vld [vmem:[%s1624_s1 + $0x78] sm:$0xff]  ;;  %v713_v0 = vld [vmem:[%s1623_s3 + $0x1a0] sm:$0xff] }
  0x22   :  { %1018 = vmatprep.subr.bf16.mxu0 %v1138_v15  ;;  %v715_v1 = vld [vmem:[%s1623_s3 + $0x1b0] sm:$0xff] }
  0x23   :  { %1013 = vmatpush1.bf16.msra.mxu1 %v1012_v6  ;;  %v1054_v6 = vpack.c.bf16 %v684_v4, %v683_v3  ;;  %v720_v3 = vld [vmem:[%s1623_s3 + $0x1d8] sm:$0xff]  ;;  %v1096_v4 = vpack.c.bf16 %v715_v1, %v713_v0  ;;  %v739_v0 = vld [vmem:[%s1624_s1 + $0xf0] sm:$0xff] }
  0x24   :  { %847 = vmatmul.mubr.f32.vlgmr.msra.gmra.mrb[0].mxu0 %v21_v25  ;;  %1015 = vmatprep.subr.bf16.mxu1 %v1014_v7  ;;  %v249_v25 = vld [vmem:[%s1624_s1 + $0x30] sm:$0xff]  ;;  %v685_v7 = vld [vmem:[%s1621_s2 + $0xc0] sm:$0xff]  ;;  %v740_v1 = vld [vmem:[%s1624_s1 + $0xf8] sm:$0xff] }
  0x25   :  { %1020 = vmatpush3.bf16.msra.mxu0 %v1019_v19  ;;  %v1028_v27 = vpack.c.bf16 %v250_v26, %v249_v25  ;;  %v1058_v10 = vpack.c.bf16 %v686_v8, %v685_v7  ;;  %v692_v19 = vld [vmem:[%s1621_s2 + $0xf8] sm:$0xff]  ;;  %881 = vmatprep.mubr.msk.f32.mxu0 %vm1139_vm1, %v1137_v5  ;;  %v694_v25 = vld [vmem:[%s1623_s3 + $0x108] sm:$0xff]  ;;  %v717_v7 = vld [vmem:[%s1623_s3 + $0x1c0] sm:$0xff] }
  0x26   :  { %1021 = vmatprep.subr.bf16.mxu0 %v1138_v15  ;;  %v1070_v20 = vpack.c.bf16 %v692_v19, %v691_v18  ;;  %v696_v26 = vld [vmem:[%s1623_s3 + $0x118] sm:$0xff]  ;;  %v719_v8 = vld [vmem:[%s1623_s3 + $0x1d0] sm:$0xff] }
  0x27   :  { %1017 = vmatpush1.bf16.msra.mxu1 %v1016_v13  ;;  %v1062_v13 = vpack.c.bf16 %v688_v12, %v687_v11  ;;  %v724_v11 = vld [vmem:[%s1623_s3 + $0x1f8] sm:$0xff]  ;;  %v1100_v12 = vpack.c.bf16 %v719_v8, %v717_v7  ;;  %v675_v7 = vld [vmem:[%s1625_s4] ss:$0 sm:$0xff] }
  0x28   :  { %1043 = vmatprep.subr.bf16.mxu1 %v1329_v14 }
  0x29   :  { %1023 = vmatpush3.bf16.msra.mxu0 %v1022_v21  ;;  %v345_v21 = vmul.f32 %v1391_v62, %v1391_v62 }
  0x2a   :  { %1024 = vmatprep.subr.bf16.mxu0 %v1138_v15 }
  0x2d   :  { %1026 = vmatpush3.bf16.msra.mxu0 %v1025_v24  ;;  %v1040_v24 = vpack.c.bf16 %v258_v23, %v257_v22 }
  0x2e   :  { %1027 = vmatprep.subr.bf16.mxu0 %v1138_v15 }
  0x31   :  { %1029 = vmatpush3.bf16.msra.mxu0 %v1028_v27  ;;  %v1074_v27 = vpack.c.bf16 %v696_v26, %v694_v25 }
  0x32   :  { %1030 = vmatprep.subr.bf16.mxu0 %v1138_v15 }
  0x35   :  { %1032 = vmatpush3.bf16.msra.mxu0 %v1031_v30  ;;  %v240_v30 = vsub.s32 0, %v1449_v29 }
  0x36   :  { %1033 = vmatprep.subr.bf16.mxu0 %v1138_v15 }
  0x39   :  { %1035 = vmatpush3.bf16.msra.mxu0 %v1034_v33 }
  0x3a   :  { %1036 = vmatprep.subr.bf16.mxu0 %v1138_v15 }
  0x3d   :  { %1038 = vmatpush3.bf16.msra.mxu0 %v1037_v36 }
  0x3e   :  { %1039 = vmatprep.subr.bf16.mxu0 %v1138_v15 }
  0x41   :  { %1041 = vmatpush3.bf16.msra.mxu0 %v1040_v24 }
  0x42   :  { %1075 = vmatprep.subr.bf16.mxu0 %v1074_v27 }
  0xf7   :  { %v848_v37 = vpop.f32.mrb[0].mxu0 }
  0xf8   :  { %v120_v38 = vrot.slane %v848_v37, 4  ;;  %v104_v39 = vpop.f32.mrb[1].mxu0 }
  0xf9   :  { %v113_v40 = vrot.slane %v104_v39, 4 }
  0xfa   :  { %v121_v41 = vadd.f32 %v848_v37, %v120_v38  ;;  %v1076_v38 = vpack.c.bf16 %v695_v32, %v693_v31 }
  0xfb   :  { %v114_v42 = vadd.f32 %v113_v40, %v104_v39  ;;  %v1078_v40 = vpack.c.bf16 %v700_v35, %v698_v34 }
  0xfc   :  { %v122_v43 = vrot.slane %v121_v41, 2 }
  0xfd   :  { %v115_v44 = vrot.slane %v114_v42, 2 }
  0xfe   :  { %v123_v45 = vadd.f32 %v122_v43, %v121_v41  ;;  %v697_v41 = vld [vmem:[%s1623_s3 + $0x120] sm:$0xff]  ;;  %v702_v43 = vld [vmem:[%s1623_s3 + $0x148] sm:$0xff] }
  0xff   :  { %v116_v46 = vadd.f32 %v115_v44, %v114_v42  ;;  %v699_v42 = vld [vmem:[%s1623_s3 + $0x130] sm:$0xff]  ;;  %v704_v44 = vld [vmem:[%s1623_s3 + $0x158] sm:$0xff] }
 0x100   :  { %v124_v47 = vrot.slane %v123_v45, 1 }
 0x101   :  { %v117_v48 = vrot.slane %v116_v46, 1 }
 0x102   :  { %v125_v49 = vadd.f32 %v124_v47, %v123_v45  ;;  %v1082_v45 = vpack.c.bf16 %v704_v44, %v702_v43  ;;  %v703_v47 = vld [vmem:[%s1623_s3 + $0x150] sm:$0xff]  ;;  %v725_v44 = vld [vmem:[%s1624_s1 + $0x80] sm:$0xff] }
 0x103   :  { %v118_v50 = vadd.f32 %v117_v48, %v116_v46  ;;  %v701_v46 = vld [vmem:[%s1623_s3 + $0x140] sm:$0xff]  ;;  %v706_v48 = vld [vmem:[%s1623_s3 + $0x168] sm:$0xff] }
 0x104   :  { %v126_v52 = vmul.f32 0.055555556, %v125_v49  ;;  %v708_v49 = vld [vmem:[%s1623_s3 + $0x178] sm:$0xff] }
 0x105   :  { %v119_v51 = vmul.f32 0.055555556, %v118_v50  ;;  %v1086_v50 = vpack.c.bf16 %v708_v49, %v706_v48  ;;  %v729_v49 = vld [vmem:[%s1624_s1 + $0xa0] sm:$0xff] }
 0x107   :  { %v127_v53 = vmul.f32 %v119_v51, %v119_v51 }
 0x109   :  { %v128_v54 = vsub.f32 %v126_v52, %v127_v53  ;;  %v707_v52 = vld [vmem:[%s1623_s3 + $0x170] sm:$0xff]  ;;  %v710_v53 = vld [vmem:[%s1623_s3 + $0x188] sm:$0xff] }
 0x10b   :  { %v129_v55 = vmax.f32 %v128_v54, 0.0  ;;  %v712_v54 = vld [vmem:[%s1623_s3 + $0x198] sm:$0xff] }
 0x10d   :  { %v130_v56 = vadd.f32 1e-05, %v129_v55 }
 0x10f   :  { %1133 = vrsqrt.f32 %v130_v56  ;;  %v1090_v56 = vpack.c.bf16 %v712_v54, %v710_v53  ;;  %v733_v54 = vld [vmem:[%s1624_s1 + $0xc0] sm:$0xff] }
 0x119   :  { %v1134_v59 = vpop.eup %1133 }
 0x11a   :  { %v132_v60 = vmul.f32 %v1134_v59, %v119_v51  ;;  %v705_v51 = vld [vmem:[%s1623_s3 + $0x160] sm:$0xff] }
 0x11b   :  { %v1088_v55 = vpack.c.bf16 %v707_v52, %v705_v51  ;;  %v731_v51 = vld [vmem:[%s1624_s1 + $0xb0] sm:$0xff]  ;;  %v732_v52 = vld [vmem:[%s1624_s1 + $0xb8] sm:$0xff] }
 0x11c   :  { %v134_v63 = vsel %vm133_vm0, %v1134_v59, %v132_v60  ;;  %v714_v59 = vld [vmem:[%s1623_s3 + $0x1a8] sm:$0xff]  ;;  %v716_v60 = vld [vmem:[%s1623_s3 + $0x1b8] sm:$0xff]  ;;  %v1116_v53 = vpack.c.bf16 %v732_v52, %v731_v51 }
 0x11d   :  { %232 = vmatmul.mubr.f32.vlgmr.msra.gmra.mrb[0].mxu1 %v134_v63  ;;  %v1094_v63 = vpack.c.bf16 %v716_v60, %v714_v59  ;;  %v737_v60 = vld [vmem:[%s1624_s1 + $0xe0] sm:$0xff] }
 0x11e   :  { %1045 = vmatpush3.bf16.msra.mxu1 %v1329_v14  ;;  %916 = vmatprep.mubr.f32.mxu1 %v1391_v62  ;;  %v689_v14 = vld [vmem:[%s1621_s2 + $0xe0] sm:$0xff] }
 0x11f   :  { %1047 = vmatprep.subr.bf16.mxu1 %v1046_v61  ;;  %v1066_v17 = vpack.c.bf16 %v690_v16, %v689_v14  ;;  %v721_v14 = vld [vmem:[%s1623_s3 + $0x1e0] sm:$0xff]  ;;  %v723_v16 = vld [vmem:[%s1623_s3 + $0x1f0] sm:$0xff] }
 0x122   :  { %1049 = vmatpush3.bf16.msra.mxu1 %v1046_v61  ;;  %v1092_v61 = vpack.c.bf16 %v711_v58, %v709_v57  ;;  %v735_v57 = vld [vmem:[%s1624_s1 + $0xd0] sm:$0xff]  ;;  %v736_v58 = vld [vmem:[%s1624_s1 + $0xd8] sm:$0xff] }
 0x123   :  { %1051 = vmatprep.subr.bf16.mxu1 %v1050_v2  ;;  %v1122_v59 = vpack.c.bf16 %v736_v58, %v735_v57 }
 0x126   :  { %1053 = vmatpush3.bf16.msra.mxu1 %v1050_v2  ;;  %v718_v2 = vld [vmem:[%s1623_s3 + $0x1c8] sm:$0xff] }
 0x127   :  { %1055 = vmatprep.subr.bf16.mxu1 %v1054_v6 }
 0x12a   :  { %1057 = vmatpush3.bf16.msra.mxu1 %v1054_v6  ;;  %v1098_v6 = vpack.c.bf16 %v720_v3, %v718_v2  ;;  %v1128_v2 = vpack.c.bf16 %v740_v1, %v739_v0  ;;  %v331_v3 = vsub.s32 1, %v1449_v29 }
 0x12b   :  { %1059 = vmatprep.subr.bf16.mxu1 %v1058_v10 }
 0x12e   :  { %1061 = vmatpush3.bf16.msra.mxu1 %v1058_v10  ;;  %v722_v10 = vld [vmem:[%s1623_s3 + $0x1e8] sm:$0xff] }
 0x12f   :  { %1063 = vmatprep.subr.bf16.mxu1 %v1062_v13 }
 0x132   :  { %1065 = vmatpush3.bf16.msra.mxu1 %v1062_v13  ;;  %v1102_v13 = vpack.c.bf16 %v724_v11, %v722_v10 }
 0x133   :  { %1067 = vmatprep.subr.bf16.mxu1 %v1066_v17 }
 0x136   :  { %1069 = vmatpush3.bf16.msra.mxu1 %v1066_v17  ;;  %v1104_v17 = vpack.c.bf16 %v723_v16, %v721_v14 }
 0x137   :  { %1071 = vmatprep.subr.bf16.mxu1 %v1070_v20 }
 0x13a   :  { %1073 = vmatpush3.bf16.msra.mxu1 %v1070_v20 }
 0x13b   :  { %1106 = vmatprep.subr.bf16.mxu1 %v1138_v15 }
 0x13d   :  { %917 = vmatmul.mubr.f32.vlgmr.msra.gmra.mrb[2].mxu1 %v345_v21 }
 0x13e   :  { %951 = vmatprep.mubr.msk.f32.mxu1 %vm1139_vm1, %v1137_v5 }
 0x1f0   :  { %v233_v33 = vpop.f32.mrb[0].mxu1 }
 0x1f1   :  { %v241_v36 = vrot.slane %v233_v33, %v240_v30  ;;  %v1466_v37 = vpop.f32.mrb[1].mxu1 }
 0x1f3   :  { %v242_v39 = vmul.f32 %v241_v36, %v1191_v9  ;;  %v1080_v9 = vpack.c.bf16 %v699_v42, %v697_v41 }
 0x1f5   :  { %882 = vmatmul.mubr.f32.vlgmr.msra.gmra.mrb[2].mxu0 %v242_v39 }
 0x1f6   :  { %1077 = vmatpush1.bf16.msra.mxu0 %v1076_v38  ;;  %556 = vmatprep.mubr.f32.mxu0 %v1137_v5  ;;  %v1084_v5 = vpack.c.bf16 %v703_v47, %v701_v46  ;;  %v728_v47 = vld [vmem:[%s1624_s1 + $0x98] sm:$0xff] }
 0x1f7   :  { %1079 = vmatprep.subr.bf16.mxu0 %v1078_v40 }
 0x1fa   :  { %1081 = vmatpush1.bf16.msra.mxu0 %v1080_v9  ;;  %v726_v9 = vld [vmem:[%s1624_s1 + $0x88] sm:$0xff] }
 0x1fb   :  { %1083 = vmatprep.subr.bf16.mxu0 %v1082_v45  ;;  %v727_v45 = vld [vmem:[%s1624_s1 + $0x90] sm:$0xff]  ;;  %v1107_v46 = vpack.c.bf16 %v726_v9, %v725_v44 }
 0x1fc   :  { %v1110_v48 = vpack.c.bf16 %v728_v47, %v727_v45 }
 0x1fd   :  { %1108 = vmatpush3.bf16.msra.mxu1 %v1107_v46 }
 0x1fe   :  { %1085 = vmatpush1.bf16.msra.mxu0 %v1084_v5  ;;  %1109 = vmatprep.subr.bf16.mxu1 %v1138_v15  ;;  %v730_v5 = vld [vmem:[%s1624_s1 + $0xa8] sm:$0xff] }
 0x1ff   :  { %1087 = vmatprep.subr.bf16.mxu0 %v1086_v50  ;;  %v1113_v50 = vpack.c.bf16 %v730_v5, %v729_v49 }
 0x201   :  { %1111 = vmatpush3.bf16.msra.mxu1 %v1110_v48 }
 0x202   :  { %1089 = vmatpush1.bf16.msra.mxu0 %v1088_v55  ;;  %1112 = vmatprep.subr.bf16.mxu1 %v1138_v15  ;;  %v734_v55 = vld [vmem:[%s1624_s1 + $0xc8] sm:$0xff] }
 0x203   :  { %1091 = vmatprep.subr.bf16.mxu0 %v1090_v56  ;;  %v1119_v56 = vpack.c.bf16 %v734_v55, %v733_v54 }
 0x205   :  { %1114 = vmatpush3.bf16.msra.mxu1 %v1113_v50 }
 0x206   :  { %1093 = vmatpush1.bf16.msra.mxu0 %v1092_v61  ;;  %1115 = vmatprep.subr.bf16.mxu1 %v1138_v15  ;;  %v738_v61 = vld [vmem:[%s1624_s1 + $0xe8] sm:$0xff] }
 0x207   :  { %1095 = vmatprep.subr.bf16.mxu0 %v1094_v63  ;;  %v1125_v63 = vpack.c.bf16 %v738_v61, %v737_v60 }
 0x209   :  { %1117 = vmatpush3.bf16.msra.mxu1 %v1116_v53 }
 0x20a   :  { %1097 = vmatpush1.bf16.msra.mxu0 %v1096_v4  ;;  %1118 = vmatprep.subr.bf16.mxu1 %v1138_v15  ;;  %v332_v4 = vrot.slane %v1466_v37, %v331_v3 }
 0x20b   :  { %1099 = vmatprep.subr.bf16.mxu0 %v1098_v6 }
 0x20d   :  { %1120 = vmatpush3.bf16.msra.mxu1 %v1119_v56 }
 0x20e   :  { %1101 = vmatpush1.bf16.msra.mxu0 %v1100_v12  ;;  %1121 = vmatprep.subr.bf16.mxu1 %v1138_v15 }
 0x20f   :  { %1103 = vmatprep.subr.bf16.mxu0 %v1102_v13 }
 0x210   :  { %v918_v18 = vpop.f32.mrb[2].mxu1 }
 0x211   :  { %v445_v19 = vrot.slane %v918_v18, 4  ;;  %v429_v20 = vpop.f32.mrb[3].mxu1  ;;  %1123 = vmatpush3.bf16.msra.mxu1 %v1122_v59 }
 0x212   :  { %v438_v21 = vrot.slane %v429_v20, 4  ;;  %1105 = vmatpush1.bf16.msra.mxu0 %v1104_v17  ;;  %1124 = vmatprep.subr.bf16.mxu1 %v1138_v15  ;;  %v742_v17 = vld [vmem:[%s1625_s4 + $0x1] ss:$0 sm:$0xff] }
 0x213   :  { %v446_v22 = vadd.f32 %v918_v18, %v445_v19 }
 0x214   :  { %v439_v23 = vadd.f32 %v438_v21, %v429_v20 }
 0x215   :  { %v447_v24 = vrot.slane %v446_v22, 2  ;;  %1126 = vmatpush3.bf16.msra.mxu1 %v1125_v63 }
 0x216   :  { %v440_v25 = vrot.slane %v439_v23, 2  ;;  %1127 = vmatprep.subr.bf16.mxu1 %v1138_v15 }
 0x217   :  { %v448_v26 = vadd.f32 %v447_v24, %v446_v22 }
 0x218   :  { %v441_v27 = vadd.f32 %v440_v25, %v439_v23 }
 0x219   :  { %v449_v28 = vrot.slane %v448_v26, 1  ;;  %1129 = vmatpush3.bf16.msra.mxu1 %v1128_v2 }
 0x21a   :  { %v442_v31 = vrot.slane %v441_v27, 1 }
 0x21b   :  { %v450_v32 = vadd.f32 %v449_v28, %v448_v26 }
 0x21c   :  { %v443_v33 = vadd.f32 %v442_v31, %v441_v27 }
 0x21d   :  { %v451_v35 = vmul.f32 0.125, %v450_v32 }
 0x21e   :  { %v444_v34 = vmul.f32 0.125, %v443_v33 }
 0x220   :  { %v452_v36 = vmul.f32 %v444_v34, %v444_v34 }
 0x222   :  { %v453_v38 = vsub.f32 %v451_v35, %v452_v36 }
 0x224   :  { %v454_v39 = vmax.f32 %v453_v38, 0.0 }
 0x226   :  { %v455_v40 = vadd.f32 1e-05, %v454_v39 }
 0x228   :  { %1135 = vrsqrt.f32 %v455_v40 }
 0x232   :  { %v1136_v41 = vpop.eup %1135 }
 0x233   :  { %v457_v42 = vmul.f32 %v1136_v41, %v444_v34 }
 0x235   :  { %v458_v43 = vsel %vm133_vm0, %v1136_v41, %v457_v42 }
 0x236   :  { %557 = vmatmul.mubr.f32.vlgmr.msra.gmra.mrb[4].mxu0 %v458_v43 }
 0x2c8   :  { %v325_v6 = vpop.f32.mrb[2].mxu0 }
 0x2c9   :  { %v333_v15 = vsub.f32 %v325_v6, %v332_v4  ;;  %v883_v8 = vpop.f32.mrb[3].mxu0 }
 0x2cb   :  { %v341_v10 = vadd.f32 %v675_v7, %v333_v15 }
 0x2cd   :  { %342 = vst [vmem:[%s1626_s5] sm:$0xff] %v341_v10 }
 0x309   :  { %v558_v11 = vpop.f32.mrb[4].mxu0 }
 0x30a   :  { %v566_v12 = vrot.slane %v558_v11, %v240_v30  ;;  %v560_v13 = vpop.f32.mrb[5].mxu0 }
 0x30b   :  { %v658_v37 = vrot.slane %v560_v13, %v331_v3 }
 0x30c   :  { %v567_v14 = vmul.f32 %v1391_v62, %v566_v12 }
 0x30e   :  { %952 = vmatmul.mubr.f32.vlgmr.msra.gmra.mrb[4].mxu1 %v567_v14 }
 0x3e1   :  { %v651_v16 = vpop.f32.mrb[4].mxu1 }
 0x3e2   :  { %v659_v18 = vsub.f32 %v651_v16, %v658_v37  ;;  %v953_v19 = vpop.f32.mrb[5].mxu1 }
 0x3e4   :  { %v668_v20 = vadd.f32 %v742_v17, %v659_v18 }
 0x3e6   :  { %743 = vst [vmem:[%s1626_s5 + $0x8] sm:$0xff] %v668_v20 }

</bundles_post_ra>
